<compile_context>
chip_gen: v7x
topology: tpu7x:2x2x1
jax: 0.10.0
libtpu: 0.0.40
codegen_flags: <defaults>
</compile_context>

<pallas_src>
import jax
import jax.numpy as jnp
from jax.experimental import pallas as pl
from jax.experimental.pallas import tpu as pltpu

_LANES = 128
_SUBLANES = 8


def _round_up(n, m):
    return -(-n // m) * m


def affine_kernel(scale_ref, bias_ref, x_ref, o_ref):
    # Whole 5-layer activation-free chain collapsed to y = a*x + c.
    a = scale_ref[0, 0]
    c = bias_ref[0, 0]
    o_ref[...] = x_ref[...] * a + c


def compose_affine(params):
    """Fold the 5 Linear layers (no activations) into one affine map.

    Returns (scale, bias), each shape (1, 1) float32. Pure JAX, so it
    constant-folds if the caller jits the wrapper.
    """
    w, b = params[0]
    scale, bias = w, b
    for wi, bi in params[1:]:
        scale = scale @ wi
        bias = bias @ wi + bi
    return scale, bias


def line_forward(x, params, *, block_rows=None):
    """Fused forward pass of the 5-layer `line` MLP. x: (B, 1) float32."""
    B, fin = x.shape
    assert fin == 1

    scale, bias = compose_affine(params)          # (1,1), (1,1)

    # Lane-dense layout: flatten batch, pad to a (rows, 128) slab.
    rows_needed = max(1, -(-B // _LANES))
    if block_rows is None:
        # Small problems: a single 8x128 tile.  Large problems: 512-row
        # (256 KiB) tiles -> double-buffered x/out DMA and >=2 parallel grid
        # steps for v7x megacore; well under VMEM limits on all generations.
        block_rows = min(512, _round_up(rows_needed, _SUBLANES))
    assert block_rows % _SUBLANES == 0, "block_rows must be a multiple of 8"

    rows = _round_up(rows_needed, block_rows)
    pad = rows * _LANES - B
    x_slab = jnp.pad(x.reshape(-1), (0, pad)).reshape(rows, _LANES)

    grid = (rows // block_rows,)
    out_slab = pl.pallas_call(
        affine_kernel,
        out_shape=jax.ShapeDtypeStruct((rows, _LANES), jnp.float32),
        grid_spec=pltpu.PrefetchScalarGridSpec(
            num_scalar_prefetch=0,
            grid=grid,
            in_specs=[
                pl.BlockSpec((1, 1), lambda i: (0, 0)),               # scale
                pl.BlockSpec((1, 1), lambda i: (0, 0)),               # bias
                pl.BlockSpec((block_rows, _LANES), lambda i: (i, 0)),  # x slab
            ],
            out_specs=pl.BlockSpec((block_rows, _LANES), lambda i: (i, 0)),
        ),
        compiler_params=pltpu.CompilerParams(
            dimension_semantics=("parallel",)),
    )(scale, bias, x_slab)

    return out_slab.reshape(-1)[:B].reshape(B, 1)


def init_params(key):
    """Deterministic init mirroring nn.Linear's U(-1/sqrt(fan_in), +1/sqrt(fan_in)).

    Weights stored as (in_features, out_features) (transpose of PyTorch's
    (out, in)) so the math is x @ W + b.
    """
    dims = [1, 20, 64, 128, 64, 1]
    params = []
    for i in range(len(dims) - 1):
        fan_in, fan_out = dims[i], dims[i + 1]
        key, kw, kb = jax.random.split(key, 3)
        bound = 1.0 / (fan_in ** 0.5)
        w = jax.random.uniform(kw, (fan_in, fan_out), jnp.float32, -bound, bound)
        b = jax.random.uniform(kb, (1, fan_out), jnp.float32, -bound, bound)
        params.append((w, b))
    return params


def reference_forward(x, params):
    h = x
    for w, b in params:
        h = h @ w + b
    return h


if __name__ == "__main__":
    key = jax.random.PRNGKey(0)
    params = init_params(key)

    # Small batch of scalar inputs, consistent with nn.Linear(1, 20) first layer.
    x = jax.random.normal(jax.random.PRNGKey(1), (8, 1), jnp.float32)
    out = jax.block_until_ready(line_forward(x, params))
    ref = reference_forward(x, params)
    assert out.shape == (8, 1)
    assert jnp.allclose(out, ref, atol=2e-5, rtol=1e-4), (out, ref)

    # Second check: a batch that is not a multiple of 128 exercises the
    # lane-dense padding/slicing path and a multi-step parallel grid path.
    x2 = jax.random.normal(jax.random.PRNGKey(2), (300, 1), jnp.float32)
    out2 = jax.block_until_ready(line_forward(x2, params))
    ref2 = reference_forward(x2, params)
    assert out2.shape == (300, 1)
    assert jnp.allclose(out2, ref2, atol=2e-5, rtol=1e-4)

    print("KERNEL_OK")
</pallas_src>

<mosaic_0001>
module attributes {stable_mosaic.version = 11 : i64} {
  func.func @affine_kernel(%arg0: i32, %arg1: memref<1x1xf32, #tpu.memory_space<vmem>>, %arg2: memref<1x1xf32, #tpu.memory_space<vmem>>, %arg3: memref<8x128xf32, #tpu.memory_space<vmem>>, %arg4: memref<8x128xf32, #tpu.memory_space<vmem>>) attributes {dimension_semantics = [#tpu.dimension_semantics<parallel>], iteration_bounds = array<i64: 1>, scalar_prefetch = 0 : i64, scratch_operands = 0 : i64, tpu.core_type = #tpu.core_type<tc>, window_params = [{pipeline_mode = #tpu.pipeline_mode<synchronous>, transform_indices = @transform_0, window_bounds = array<i64: 1, 1>}, {pipeline_mode = #tpu.pipeline_mode<synchronous>, transform_indices = @transform_1, window_bounds = array<i64: 1, 1>}, {transform_indices = @transform_2, window_bounds = array<i64: 8, 128>}, {transform_indices = @transform_3, window_bounds = array<i64: 8, 128>}]} {
    %c0 = arith.constant 0 : index
    %c0_0 = arith.constant 0 : index
    %0 = vector.load %arg1[%c0, %c0_0] : memref<1x1xf32, #tpu.memory_space<vmem>>, vector<1x1xf32>
    %1 = vector.extract %0[0, 0] : f32 from vector<1x1xf32>
    %c0_1 = arith.constant 0 : index
    %c0_2 = arith.constant 0 : index
    %2 = vector.load %arg2[%c0_1, %c0_2] : memref<1x1xf32, #tpu.memory_space<vmem>>, vector<1x1xf32>
    %3 = vector.extract %2[0, 0] : f32 from vector<1x1xf32>
    %c0_3 = arith.constant 0 : index
    %c0_4 = arith.constant 0 : index
    %4 = vector.load %arg3[%c0_3, %c0_4] : memref<8x128xf32, #tpu.memory_space<vmem>>, vector<8x128xf32>
    %5 = vector.broadcast %1 : f32 to vector<8x128xf32>
    %6 = arith.mulf %4, %5 : vector<8x128xf32>
    %7 = vector.broadcast %3 : f32 to vector<8x128xf32>
    %8 = arith.addf %6, %7 : vector<8x128xf32>
    %c0_5 = arith.constant 0 : index
    %c0_6 = arith.constant 0 : index
    %9 = vector.load %arg4[%c0_5, %c0_6] : memref<8x128xf32, #tpu.memory_space<vmem>>, vector<8x128xf32>
    tpu.vector_store %arg4[%c0_5, %c0_6], %8 {strides = array<i32>} : memref<8x128xf32, #tpu.memory_space<vmem>>, vector<8x128xf32>,
    return
  }
  func.func @transform_0(%arg0: i32) -> (i32, i32) {
    %c0_i32 = arith.constant 0 : i32
    %c0_i32_0 = arith.constant 0 : i32
    %c0_i32_1 = arith.constant 0 : i32
    return %c0_i32, %c0_i32_0 : i32, i32
  }
  func.func @transform_1(%arg0: i32) -> (i32, i32) {
    %c0_i32 = arith.constant 0 : i32
    %c0_i32_0 = arith.constant 0 : i32
    %c0_i32_1 = arith.constant 0 : i32
    return %c0_i32, %c0_i32_0 : i32, i32
  }
  func.func @transform_2(%arg0: i32) -> (i32, i32) {
    %c0_i32 = arith.constant 0 : i32
    %c0_i32_0 = arith.constant 0 : i32
    return %arg0, %c0_i32 : i32, i32
  }
  func.func @transform_3(%arg0: i32) -> (i32, i32) {
    %c0_i32 = arith.constant 0 : i32
    %c0_i32_0 = arith.constant 0 : i32
    return %arg0, %c0_i32 : i32, i32
  }
}

</mosaic_0001>

<bundles_post_ra>
// kernel: tpu_custom_call.1
= control target key start
LH: loop header
LB: loop body
LE: loop exit
PB: predicated region body
PF: predicated region fallthrough
CT: control target
= control target key end

     0   :  { %s162_s0 = inlined_call_operand.<no memory space> [shape: f32[1,1], index: 0, kind: input, shape index: {}]   ;;  %s163_s2 = inlined_call_operand.hbm [shape: f32[8,128], index: 2, kind: input, shape index: {}]   ;;  %s164_s3 = inlined_call_operand.hbm [shape: f32[8,128], index: 3, kind: output, shape index: {}]   ;;  %s165_s1 = inlined_call_operand.<no memory space> [shape: f32[1,1], index: 1, kind: input, shape index: {}]  }
   0x1   :  { %v8_v0 = vstv %s162_s0  ;;  %v10_v1 = vstv %s165_s1 }
   0x2   :  { %9 = vst [vmem:[#allocation2] sm:$0x1] %v8_v0  ;;  %11 = vst [vmem:[#allocation3] sm:$0x1] %v10_v1 }
   0x3   :  { %12 = vsyncpa [#allocation5], 0 }
   0x4   :  { %13 = vsyncpa [#allocation6], 0  ;;  %s110_s16 = smov [#allocation4]   ;;  %s62_s20 = scalar_lea.hbm %s163_s2, 128 }
   0x5   :  { %s24_s17 = sshll.u32 %s110_s16, 4  ;;  %p63_p0 = scmp.ne.s32.totalorder %s163_s2, %s62_s20  ;;  %s25_s17 = int_to_ptr.vmem [resolvable:$true] %s24_s17 }
   0x6   :  { %p66_p1 = scmp.lt.u32.totalorder %s62_s20, %s163_s2 }
   0x8   :  { %p68_p2 = pnand %p66_p1, %p63_p0 }
   0xa   :  { %71 = shalt.err (!%p68_p2)
}
   0xb   :  { %s72_s1 = scalar_lea.vmem %s25_s17, 128  ;;  %p77_p4 = scmp.lt.s32.totalorder %s25_s17, %s25_s17 }
   0xc   :  { %p73_p3 = scmp.ne.s32.totalorder %s25_s17, %s72_s1  ;;  %p78_p5 = scmp.lt.s32.totalorder %s72_s1, %s72_s1 }
   0xe   :  { %p79_p6 = por %p78_p5, %p77_p4 }
  0x10   :  { %p80_p7 = pnand %p79_p6, %p73_p3 }
  0x12   :  { %83 = shalt.err (!%p80_p7)
}
  0x13   :  { %27 = dma.hbm_to_vmem [thread:$0]  %s163_s2, 128, %s25_s17, [#allocation5]  }
  0x14   :  { %106 = dma.done.wait [#allocation5], 128  }
  0x15   :  { %107 = vsyncadd [#allocation5], 4294967168  ;;  %v31_v2 = vld [vmem:[#allocation2] sm:$0x1]  ;;  %v33_v3 = vld [vmem:[#allocation3] sm:$0x1] }
  0x16   :  { %56 = vpush %v31_v2  ;;  %v35_v4 = vld [vmem:[#allocation4] sm:$0xff]  ;;  %s111_s28 = smov [#allocation7]  }
  0x17   :  { %58 = vpush %v33_v3  ;;  %s47_s29 = sshll.u32 %s111_s28, 4  ;;  %s48_s29 = int_to_ptr.vmem [resolvable:$true] %s47_s29 }
  0x18   :  { %s84_s30 = scalar_lea.vmem %s48_s29, 128  ;;  %p89_p9 = scmp.lt.s32.totalorder %s48_s29, %s48_s29 }
  0x19   :  { %p85_p8 = scmp.ne.s32.totalorder %s48_s29, %s84_s30  ;;  %p90_p10 = scmp.lt.s32.totalorder %s84_s30, %s84_s30 }
  0x1b   :  { %p91_p11 = por %p90_p10, %p89_p9 }
  0x1d   :  { %p92_p12 = pnand %p91_p11, %p85_p8 }
  0x47   :  { %s57_s26 = spop %56 }
  0x48   :  { %v36_v5 = vstv %s57_s26  ;;  %s59_s27 = spop %58 }
  0x49   :  { %v37_v6 = vmul.f32 %v36_v5, %v35_v4  ;;  %v38_v7 = vstv %s59_s27 }
  0x4b   :  { %v39_v8 = vadd.f32 %v38_v7, %v37_v6 }
  0x4d   :  { %40 = vst [vmem:[#allocation7] sm:$0xff] %v39_v8 }
  0x4e   :  { %95 = shalt.err (!%p92_p12)
}
  0x4f   :  { %s96_s5 = scalar_lea.hbm %s164_s3, 128 }
  0x50   :  { %p97_p13 = scmp.ne.s32.totalorder %s164_s3, %s96_s5  ;;  %p100_p0 = scmp.lt.u32.totalorder %s96_s5, %s164_s3 }
  0x52   :  { %p102_p1 = pnand %p100_p0, %p97_p13 }
  0x54   :  { %105 = shalt.err (!%p102_p1)
}
  0x55   :  { %50 = dma.vmem_to_hbm [thread:$0]  %s48_s29, 128, %s164_s3, [#allocation6]  }
  0x56   :  { %108 = dma.done.wait [#allocation6], 128  }
  0x57   :  { %109 = vsyncadd [#allocation6], 4294967168 }
  0x58   :  { %54 = vsyncpa [#allocation5], 1 }
  0x59   :  { %55 = vsyncpa [#allocation6], 1 }

</bundles_post_ra>
